<compile_context>
chip_gen: v5e
topology: v5e:2x2
jax: 0.10.0
libtpu: 0.0.40
codegen_flags: <defaults>
</compile_context>

<pallas_src>
import jax
import jax.numpy as jnp
import numpy as np
from jax import lax
from jax.experimental import pallas as pl
from jax.experimental.pallas import tpu as pltpu

_VMEM_LIMIT = 48 * 1024 * 1024          # leave headroom on v7x (64 MiB / TC)
_MATMUL_DTYPE = jnp.bfloat16            # production dtype for big MXU matmuls


def _sigmoid(x):
    # sigma(x) == 0.5*(1 + tanh(x/2)): single EUP op, no divide on the
    # per-timestep serial dependence chain.
    return 0.5 * (jnp.tanh(0.5 * x) + 1.0)


# ----------------------------------------------------------------------------
# Fused bidirectional GRU layer kernel
# ----------------------------------------------------------------------------

def _bigru_layer_kernel(x_ref, w_ih_ref, gxb_ref, w_hh_ref, bhn_ref, len_ref,
                        out_ref, gx_ref):
    """One bidirectional, length-masked GRU layer.

    x_ref:    (T*B, D)   time-major layer input, flattened over (T, B)
    w_ih_ref: (D, 6H)    input->gate weights, cols = [r_f z_f n_f | r_b z_b n_b]
    gxb_ref:  (1, 6H)    folded bias: b_ih + [b_hh_r, b_hh_z, 0] per direction
    w_hh_ref: (2H, 6H)   block-diagonal recurrent weights (h_cat @ W form)
    bhn_ref:  (1, 6H)    [0, 0, b_hh_n_f | 0, 0, b_hh_n_b]
    len_ref:  (B, 1)     int32 valid lengths
    out_ref:  (T, B, 2H) fwd outputs in [..., :H], bwd in [..., H:]
    gx_ref:   (T, B, 6H) VMEM scratch holding the hoisted input projection
    """
    T, B, H2 = out_ref.shape
    H = H2 // 2

    # ---- Hoisted input projection for all timesteps & both directions.
    # Chunked over T so each matmul has ~256 MXU rows and the compiler never
    # materializes the full (T*B, 6H) temporary; scattered once into the
    # time-indexed scratch (off the serial recurrent path).
    tc = max(1, 256 // B)                             # timesteps per chunk
    for c0 in range(0, T, tc):
        c1 = min(c0 + tc, T)
        chunk = (jnp.dot(x_ref[pl.ds(c0 * B, (c1 - c0) * B), :],
                         w_ih_ref[...],
                         preferred_element_type=jnp.float32)
                 + gxb_ref[...]).astype(gx_ref.dtype)        # ((c1-c0)*B, 6H)
        for t in range(c0, c1):
            gx_ref[t] = chunk[(t - c0) * B:(t - c0 + 1) * B, :]

    lens = len_ref[...]                               # (B, 1) int32
    bhn = bhn_ref[...]                                # (1, 6H) f32

    def one_step(s, h_cat):
        # Forward chain consumes time step s, backward chain consumes T-1-s:
        # a single block-diagonal (B,2H)x(2H,6H) matmul drives both directions
        # and all three gates (one MXU push per step instead of six).
        t_f = s
        t_b = T - 1 - s
        row_f = gx_ref[t_f]                           # (B, 6H)
        row_b = gx_ref[t_b]                           # (B, 6H)

        gh = jnp.dot(h_cat, w_hh_ref[...],
                     preferred_element_type=jnp.float32) + bhn   # (B, 6H)

        h_f = h_cat[:, :H]
        h_b = h_cat[:, H:]

        r_f = _sigmoid(row_f[:, 0:H] + gh[:, 0:H])
        z_f = _sigmoid(row_f[:, H:2 * H] + gh[:, H:2 * H])
        n_f = jnp.tanh(row_f[:, 2 * H:3 * H] + r_f * gh[:, 2 * H:3 * H])
        hn_f = (1.0 - z_f) * n_f + z_f * h_f

        r_b = _sigmoid(row_b[:, 3 * H:4 * H] + gh[:, 3 * H:4 * H])
        z_b = _sigmoid(row_b[:, 4 * H:5 * H] + gh[:, 4 * H:5 * H])
        n_b = jnp.tanh(row_b[:, 5 * H:6 * H] + r_b * gh[:, 5 * H:6 * H])
        hn_b = (1.0 - z_b) * n_b + z_b * h_b

        valid_f = t_f < lens                          # (B, 1) bool
        valid_b = t_b < lens
        # pack_padded semantics: hidden frozen / output zeroed past length.
        out_ref[t_f, :, pl.ds(0, H)] = jnp.where(valid_f, hn_f, 0.0).astype(out_ref.dtype)
        out_ref[t_b, :, pl.ds(H, H)] = jnp.where(valid_b, hn_b, 0.0).astype(out_ref.dtype)
        return jnp.concatenate(
            [jnp.where(valid_f, hn_f, h_f), jnp.where(valid_b, hn_b, h_b)],
            axis=1)

    # Manual 2x-unrolled time loop (bounded live ranges, no dependence on
    # fori_loop's unroll= lowering support).
    n_pairs = T // 2

    def step_pair(i, h_cat):
        h_cat = one_step(2 * i, h_cat)
        return one_step(2 * i + 1, h_cat)

    h = jnp.zeros((B, 2 * H), jnp.float32)
    h = lax.fori_loop(0, n_pairs, step_pair, h)
    if T % 2:
        h = one_step(T - 1, h)


def bigru_layer(x_tbd, layer_params, lens_col, matmul_dtype=_MATMUL_DTYPE):
    """Run one fused bidirectional GRU layer on time-major (T, B, D) input."""
    T, B, D = x_tbd.shape
    fp, bp = layer_params["fwd"], layer_params["bwd"]
    H = fp["w_hh"].shape[1]

    def dir_pack(p):
        w_ih_t = p["w_ih"].T                                           # (D, 3H)
        gx_b = p["b_ih"] + jnp.concatenate(
            [p["b_hh"][:2 * H], jnp.zeros((H,), jnp.float32)])         # fold b_hh r,z
        w = p["w_hh"].reshape(3, H, H)                                 # (gate, out, in)
        hh_blk = jnp.concatenate([w[0].T, w[1].T, w[2].T], axis=1)     # (H, 3H), h@W form
        b_hn = p["b_hh"][2 * H:]
        return w_ih_t, gx_b, hh_blk, b_hn

    wf, gbf, hf, bnf = dir_pack(fp)
    wb, gbb, hb, bnb = dir_pack(bp)

    w_ih_stack = jnp.concatenate([wf, wb], axis=1)                     # (D, 6H)
    gx_bias = jnp.concatenate([gbf, gbb]).reshape(1, 6 * H)            # (1, 6H)
    zHH = jnp.zeros((H, 3 * H), jnp.float32)
    w_hh_big = jnp.concatenate(
        [jnp.concatenate([hf, zHH], axis=1),
         jnp.concatenate([zHH, hb], axis=1)], axis=0)                  # (2H, 6H)
    zH = jnp.zeros((H,), jnp.float32)
    bhn_vec = jnp.concatenate([zH, zH, bnf, zH, zH, bnb]).reshape(1, 6 * H)

    x2d = x_tbd.reshape(T * B, D).astype(matmul_dtype)
    w_ih_c = w_ih_stack.astype(matmul_dtype)

    return pl.pallas_call(
        _bigru_layer_kernel,
        out_shape=jax.ShapeDtypeStruct((T, B, 2 * H), matmul_dtype),
        grid=(1,),
        in_specs=[
            pl.BlockSpec((T * B, D), lambda i: (0, 0)),
            pl.BlockSpec((D, 6 * H), lambda i: (0, 0)),
            pl.BlockSpec((1, 6 * H), lambda i: (0, 0)),
            pl.BlockSpec((2 * H, 6 * H), lambda i: (0, 0)),
            pl.BlockSpec((1, 6 * H), lambda i: (0, 0)),
            pl.BlockSpec((B, 1), lambda i: (0, 0)),
        ],
        out_specs=pl.BlockSpec((T, B, 2 * H), lambda i: (0, 0, 0)),
        scratch_shapes=[pltpu.VMEM((T, B, 6 * H), matmul_dtype)],
        compiler_params=pltpu.CompilerParams(
            dimension_semantics=("arbitrary",),
            vmem_limit_bytes=_VMEM_LIMIT),
    )(x2d, w_ih_c, gx_bias, w_hh_big, bhn_vec, lens_col)
    # TODO(synk): at very large T*B*H (v7x, 64 MiB VMEM) the gx scratch / x /
    # out slabs should be streamed in T-chunks (emit_pipeline) instead of kept
    # fully VMEM-resident; fusing all 3 layers into one call is a further win.


# ----------------------------------------------------------------------------
# fc_out linear kernel (vocab-tiled, lane-dense)
# ----------------------------------------------------------------------------

def _linear_kernel(x_ref, w_ref, b_ref, o_ref):
    o_ref[...] = (jnp.dot(x_ref[...], w_ref[...],
                          preferred_element_type=jnp.float32) + b_ref[...])


def linear(x, w_t, b, *, n_tile=512, matmul_dtype=_MATMUL_DTYPE):
    """x: (M, K), w_t: (K, N), b: (N,) -> (M, N) f32, tiled over N."""
    M, K = x.shape
    N = w_t.shape[1]
    tn = min(n_tile, N)
    grid_n = pl.cdiv(N, tn)
    n_pad = grid_n * tn - N
    if n_pad:
        w_t = jnp.pad(w_t, ((0, 0), (0, n_pad)))
        b = jnp.pad(b, (0, n_pad))
    out = pl.pallas_call(
        _linear_kernel,
        out_shape=jax.ShapeDtypeStruct((M, N + n_pad), jnp.float32),
        grid=(grid_n,),
        in_specs=[
            pl.BlockSpec((M, K), lambda j: (0, 0)),
            pl.BlockSpec((K, tn), lambda j: (0, j)),
            pl.BlockSpec((1, tn), lambda j: (0, j)),
        ],
        out_specs=pl.BlockSpec((M, tn), lambda j: (0, j)),
        compiler_params=pltpu.CompilerParams(
            dimension_semantics=("parallel",),
            vmem_limit_bytes=_VMEM_LIMIT),
    )(x.astype(matmul_dtype), w_t.astype(matmul_dtype),
      b.astype(jnp.float32).reshape(1, N + n_pad))
    return out[:, :N] if n_pad else out


# ----------------------------------------------------------------------------
# Full forward pass (mirrors DecoderRNNV5.forward)
# ----------------------------------------------------------------------------

def decoder_forward(params, features, captions, cap_lengths,
                    matmul_dtype=_MATMUL_DTYPE):
    """features: (B, E) f32; captions: (B, T_cap) int32; cap_lengths: list[int]."""
    lens = jnp.asarray(cap_lengths, jnp.int32)
    t_max = int(max(cap_lengths))
    B = features.shape[0]

    # fc_in: tiny (B,E)x(E,E) matmul -> plain XLA (per perf review).
    feats = features @ params["fc_in_w"].T + params["fc_in_b"]          # (B, E)
    cap_emb = jnp.take(params["embed_w"], captions, axis=0)             # (B, T_cap, E)
    combined = jnp.concatenate([feats[:, None, :], cap_emb], axis=1)    # (B, T_cap+1, E)

    # Time-major layout for the whole recurrent stack (one transpose in/out).
    x = jnp.transpose(combined[:, :t_max, :], (1, 0, 2))                # (T, B, E)
    lens_col = lens.reshape(B, 1)

    for layer in range(3):
        x = bigru_layer(x, params["gru"][layer], lens_col, matmul_dtype)  # (T, B, 2H)

    T, _, H2 = x.shape
    logits = linear(x.reshape(T * B, H2), params["fc_out_w"].T,
                    params["fc_out_b"], matmul_dtype=matmul_dtype)
    return jnp.transpose(logits.reshape(T, B, -1), (1, 0, 2))            # (B, T, V)


# ----------------------------------------------------------------------------
# Pure-JAX reference (independent formulation with explicit sequence reversal)
# ----------------------------------------------------------------------------

def reverse_padded(x_btd, lens):
    B, T, _ = x_btd.shape
    t_idx = jnp.arange(T)[None, :]
    rev_idx = lens[:, None] - 1 - t_idx
    valid = rev_idx >= 0
    rev_idx = jnp.clip(rev_idx, 0, T - 1)
    g = jnp.take_along_axis(x_btd, rev_idx[:, :, None], axis=1)
    return jnp.where(valid[:, :, None], g, 0.0)


def ref_gru_dir(x_btd, gp, lens):
    B, T, _ = x_btd.shape
    H = gp["w_hh"].shape[1]
    h = jnp.zeros((B, H), jnp.float32)
    outs = []
    for t in range(T):
        x_t = x_btd[:, t]
        gx = x_t @ gp["w_ih"].T + gp["b_ih"]
        gh = h @ gp["w_hh"].T + gp["b_hh"]
        r = _sigmoid(gx[:, :H] + gh[:, :H])
        z = _sigmoid(gx[:, H:2 * H] + gh[:, H:2 * H])
        n = jnp.tanh(gx[:, 2 * H:] + r * gh[:, 2 * H:])
        h_new = (1.0 - z) * n + z * h
        valid = (t < lens)[:, None]
        h = jnp.where(valid, h_new, h)
        outs.append(jnp.where(valid, h_new, 0.0))
    return jnp.stack(outs, axis=1)


def ref_forward(params, features, captions, cap_lengths):
    lens = jnp.asarray(cap_lengths, jnp.int32)
    t_max = int(max(cap_lengths))
    feats = features @ params["fc_in_w"].T + params["fc_in_b"]
    cap_emb = jnp.take(params["embed_w"], captions, axis=0)
    x = jnp.concatenate([feats[:, None, :], cap_emb], axis=1)[:, :t_max, :]
    for layer in range(3):
        fwd = ref_gru_dir(x, params["gru"][layer]["fwd"], lens)
        bwd = reverse_padded(
            ref_gru_dir(reverse_padded(x, lens), params["gru"][layer]["bwd"], lens),
            lens)
        x = jnp.concatenate([fwd, bwd], axis=-1)
    return x @ params["fc_out_w"].T + params["fc_out_b"]


# ----------------------------------------------------------------------------
# Parameter init + driver
# ----------------------------------------------------------------------------

def init_params(key, embed_size, hidden_size, vocab_size):
    E, H, V = embed_size, hidden_size, vocab_size
    ks = jax.random.split(key, 8)

    def u(k, shape, fan):
        bound = 1.0 / np.sqrt(fan)
        return jax.random.uniform(k, shape, jnp.float32, -bound, bound)

    params = {
        "embed_w": jax.random.normal(ks[0], (V, E), jnp.float32),
        "fc_in_w": u(ks[1], (E, E), E), "fc_in_b": u(ks[2], (E,), E),
        "fc_out_w": u(ks[3], (V, 2 * H), 2 * H), "fc_out_b": u(ks[4], (V,), 2 * H),
        "gru": [],
    }
    gk = jax.random.split(ks[5], 3 * 2 * 4).reshape(3, 2, 4, 2)
    for layer in range(3):
        d_in = E if layer == 0 else 2 * H
        layer_p = {}
        for di, dname in enumerate(("fwd", "bwd")):
            layer_p[dname] = {
                "w_ih": u(gk[layer, di, 0], (3 * H, d_in), H),
                "w_hh": u(gk[layer, di, 1], (3 * H, H), H),
                "b_ih": u(gk[layer, di, 2], (3 * H,), H),
                "b_hh": u(gk[layer, di, 3], (3 * H,), H),
            }
        params["gru"].append(layer_p)
    return params


if __name__ == "__main__":
    embed_size, hidden_size, vocab_size = 32, 32, 64
    B, T_cap = 2, 7                       # combined sequence length = T_cap + 1 = 8
    cap_lengths = [8, 6]                  # per-batch valid lengths (batch_first)

    key = jax.random.PRNGKey(0)
    k_p, k_f, k_c = jax.random.split(key, 3)
    params = init_params(k_p, embed_size, hidden_size, vocab_size)

    features = jax.random.normal(k_f, (B, embed_size), jnp.float32)
    captions = jax.random.randint(k_c, (B, T_cap), 0, vocab_size, jnp.int32)

    ref = jax.block_until_ready(ref_forward(params, features, captions, cap_lengths))

    # Exact-math check: f32 MXU operands / f32 activations.
    out_f32 = jax.block_until_ready(
        decoder_forward(params, features, captions, cap_lengths,
                        matmul_dtype=jnp.float32))
    assert out_f32.shape == (B, max(cap_lengths), vocab_size), out_f32.shape
    err_f32 = float(jnp.max(jnp.abs(out_f32 - ref)))
    assert err_f32 < 2e-3, f"f32 mismatch vs reference: {err_f32}"

    # Production path: bf16 MXU operands / bf16 inter-layer activations
    # (f32 accumulate and f32 recurrent elementwise math).
    out_bf16 = jax.block_until_ready(
        decoder_forward(params, features, captions, cap_lengths,
                        matmul_dtype=jnp.bfloat16))
    err_bf16 = float(jnp.max(jnp.abs(out_bf16.astype(jnp.float32) - ref)))
    assert err_bf16 < 1.5e-1, f"bf16 mismatch vs reference: {err_bf16}"

    print("KERNEL_OK")
</pallas_src>

<mosaic_0001>
module attributes {stable_mosaic.version = 11 : i64} {
  func.func @_bigru_layer_kernel(%arg0: i32, %arg1: memref<16x32xf32, #tpu.memory_space<vmem>>, %arg2: memref<32x192xf32, #tpu.memory_space<vmem>>, %arg3: memref<1x192xf32, #tpu.memory_space<vmem>>, %arg4: memref<64x192xf32, #tpu.memory_space<vmem>>, %arg5: memref<1x192xf32, #tpu.memory_space<vmem>>, %arg6: memref<2x1xi32, #tpu.memory_space<vmem>>, %arg7: memref<8x2x64xf32, #tpu.memory_space<vmem>>, %arg8: memref<8x2x192xf32, #tpu.memory_space<vmem>>) attributes {dimension_semantics = [#tpu.dimension_semantics<arbitrary>], iteration_bounds = array<i64: 1>, scalar_prefetch = 0 : i64, scratch_operands = 1 : i64, tpu.core_type = #tpu.core_type<tc>, window_params = [{pipeline_mode = #tpu.pipeline_mode<synchronous>, transform_indices = @transform_0, window_bounds = array<i64: 16, 32>}, {pipeline_mode = #tpu.pipeline_mode<synchronous>, transform_indices = @transform_1, window_bounds = array<i64: 32, 192>}, {pipeline_mode = #tpu.pipeline_mode<synchronous>, transform_indices = @transform_2, window_bounds = array<i64: 1, 192>}, {pipeline_mode = #tpu.pipeline_mode<synchronous>, transform_indices = @transform_3, window_bounds = array<i64: 64, 192>}, {pipeline_mode = #tpu.pipeline_mode<synchronous>, transform_indices = @transform_4, window_bounds = array<i64: 1, 192>}, {pipeline_mode = #tpu.pipeline_mode<synchronous>, transform_indices = @transform_5, window_bounds = array<i64: 2, 1>}, {pipeline_mode = #tpu.pipeline_mode<synchronous>, transform_indices = @transform_6, window_bounds = array<i64: 8, 2, 64>}]} {
    %c0 = arith.constant 0 : index
    %c0_0 = arith.constant 0 : index
    %0 = vector.load %arg1[%c0, %c0_0] : memref<16x32xf32, #tpu.memory_space<vmem>>, vector<16x32xf32>
    %c0_1 = arith.constant 0 : index
    %c0_2 = arith.constant 0 : index
    %1 = vector.load %arg2[%c0_1, %c0_2] : memref<32x192xf32, #tpu.memory_space<vmem>>, vector<32x192xf32>
    %cst = arith.constant dense<0.000000e+00> : vector<16x192xf32>
    %2 = tpu.matmul %0, %1, %cst {dimension_numbers = #tpu.dot_dimension_numbers<[1], [0], [0], [1], [0, 0, 1, 1], [], []>} : vector<16x32xf32>, vector<32x192xf32>, vector<16x192xf32> -> vector<16x192xf32>
    %c0_3 = arith.constant 0 : index
    %c0_4 = arith.constant 0 : index
    %3 = vector.load %arg3[%c0_3, %c0_4] : memref<1x192xf32, #tpu.memory_space<vmem>>, vector<1x192xf32>
    %4 = vector.broadcast %3 : vector<1x192xf32> to vector<16x192xf32>
    %5 = arith.addf %2, %4 : vector<16x192xf32>
    %6 = vector.extract_strided_slice %5 {offsets = [0, 0], sizes = [2, 192], strides = [1, 1]} : vector<16x192xf32> to vector<2x192xf32>
    %c0_5 = arith.constant 0 : index
    %c0_6 = arith.constant 0 : index
    %c0_7 = arith.constant 0 : index
    %7 = vector.load %arg8[%c0_5, %c0_6, %c0_7] : memref<8x2x192xf32, #tpu.memory_space<vmem>>, vector<1x2x192xf32>
    %8 = vector.shape_cast %7 : vector<1x2x192xf32> to vector<2x192xf32>
    %9 = vector.shape_cast %6 : vector<2x192xf32> to vector<1x2x192xf32>
    tpu.vector_store %arg8[%c0_5, %c0_6, %c0_7], %9 {strides = array<i32>} : memref<8x2x192xf32, #tpu.memory_space<vmem>>, vector<1x2x192xf32>,
    %10 = vector.extract_strided_slice %5 {offsets = [2, 0], sizes = [2, 192], strides = [1, 1]} : vector<16x192xf32> to vector<2x192xf32>
    %c1 = arith.constant 1 : index
    %c0_8 = arith.constant 0 : index
    %c0_9 = arith.constant 0 : index
    %11 = vector.load %arg8[%c1, %c0_8, %c0_9] : memref<8x2x192xf32, #tpu.memory_space<vmem>>, vector<1x2x192xf32>
    %12 = vector.shape_cast %11 : vector<1x2x192xf32> to vector<2x192xf32>
    %13 = vector.shape_cast %10 : vector<2x192xf32> to vector<1x2x192xf32>
    tpu.vector_store %arg8[%c1, %c0_8, %c0_9], %13 {strides = array<i32>} : memref<8x2x192xf32, #tpu.memory_space<vmem>>, vector<1x2x192xf32>,
    %14 = vector.extract_strided_slice %5 {offsets = [4, 0], sizes = [2, 192], strides = [1, 1]} : vector<16x192xf32> to vector<2x192xf32>
    %c2 = arith.constant 2 : index
    %c0_10 = arith.constant 0 : index
    %c0_11 = arith.constant 0 : index
    %15 = vector.load %arg8[%c2, %c0_10, %c0_11] : memref<8x2x192xf32, #tpu.memory_space<vmem>>, vector<1x2x192xf32>
    %16 = vector.shape_cast %15 : vector<1x2x192xf32> to vector<2x192xf32>
    %17 = vector.shape_cast %14 : vector<2x192xf32> to vector<1x2x192xf32>
    tpu.vector_store %arg8[%c2, %c0_10, %c0_11], %17 {strides = array<i32>} : memref<8x2x192xf32, #tpu.memory_space<vmem>>, vector<1x2x192xf32>,
    %18 = vector.extract_strided_slice %5 {offsets = [6, 0], sizes = [2, 192], strides = [1, 1]} : vector<16x192xf32> to vector<2x192xf32>
    %c3 = arith.constant 3 : index
    %c0_12 = arith.constant 0 : index
    %c0_13 = arith.constant 0 : index
    %19 = vector.load %arg8[%c3, %c0_12, %c0_13] : memref<8x2x192xf32, #tpu.memory_space<vmem>>, vector<1x2x192xf32>
    %20 = vector.shape_cast %19 : vector<1x2x192xf32> to vector<2x192xf32>
    %21 = vector.shape_cast %18 : vector<2x192xf32> to vector<1x2x192xf32>
    tpu.vector_store %arg8[%c3, %c0_12, %c0_13], %21 {strides = array<i32>} : memref<8x2x192xf32, #tpu.memory_space<vmem>>, vector<1x2x192xf32>,
    %22 = vector.extract_strided_slice %5 {offsets = [8, 0], sizes = [2, 192], strides = [1, 1]} : vector<16x192xf32> to vector<2x192xf32>
    %c4 = arith.constant 4 : index
    %c0_14 = arith.constant 0 : index
    %c0_15 = arith.constant 0 : index
    %23 = vector.load %arg8[%c4, %c0_14, %c0_15] : memref<8x2x192xf32, #tpu.memory_space<vmem>>, vector<1x2x192xf32>
    %24 = vector.shape_cast %23 : vector<1x2x192xf32> to vector<2x192xf32>
    %25 = vector.shape_cast %22 : vector<2x192xf32> to vector<1x2x192xf32>
    tpu.vector_store %arg8[%c4, %c0_14, %c0_15], %25 {strides = array<i32>} : memref<8x2x192xf32, #tpu.memory_space<vmem>>, vector<1x2x192xf32>,
    %26 = vector.extract_strided_slice %5 {offsets = [10, 0], sizes = [2, 192], strides = [1, 1]} : vector<16x192xf32> to vector<2x192xf32>
    %c5 = arith.constant 5 : index
    %c0_16 = arith.constant 0 : index
    %c0_17 = arith.constant 0 : index
    %27 = vector.load %arg8[%c5, %c0_16, %c0_17] : memref<8x2x192xf32, #tpu.memory_space<vmem>>, vector<1x2x192xf32>
    %28 = vector.shape_cast %27 : vector<1x2x192xf32> to vector<2x192xf32>
    %29 = vector.shape_cast %26 : vector<2x192xf32> to vector<1x2x192xf32>
    tpu.vector_store %arg8[%c5, %c0_16, %c0_17], %29 {strides = array<i32>} : memref<8x2x192xf32, #tpu.memory_space<vmem>>, vector<1x2x192xf32>,
    %30 = vector.extract_strided_slice %5 {offsets = [12, 0], sizes = [2, 192], strides = [1, 1]} : vector<16x192xf32> to vector<2x192xf32>
    %c6 = arith.constant 6 : index
    %c0_18 = arith.constant 0 : index
    %c0_19 = arith.constant 0 : index
    %31 = vector.load %arg8[%c6, %c0_18, %c0_19] : memref<8x2x192xf32, #tpu.memory_space<vmem>>, vector<1x2x192xf32>
    %32 = vector.shape_cast %31 : vector<1x2x192xf32> to vector<2x192xf32>
    %33 = vector.shape_cast %30 : vector<2x192xf32> to vector<1x2x192xf32>
    tpu.vector_store %arg8[%c6, %c0_18, %c0_19], %33 {strides = array<i32>} : memref<8x2x192xf32, #tpu.memory_space<vmem>>, vector<1x2x192xf32>,
    %34 = vector.extract_strided_slice %5 {offsets = [14, 0], sizes = [2, 192], strides = [1, 1]} : vector<16x192xf32> to vector<2x192xf32>
    %c7 = arith.constant 7 : index
    %c0_20 = arith.constant 0 : index
    %c0_21 = arith.constant 0 : index
    %35 = vector.load %arg8[%c7, %c0_20, %c0_21] : memref<8x2x192xf32, #tpu.memory_space<vmem>>, vector<1x2x192xf32>
    %36 = vector.shape_cast %35 : vector<1x2x192xf32> to vector<2x192xf32>
    %37 = vector.shape_cast %34 : vector<2x192xf32> to vector<1x2x192xf32>
    tpu.vector_store %arg8[%c7, %c0_20, %c0_21], %37 {strides = array<i32>} : memref<8x2x192xf32, #tpu.memory_space<vmem>>, vector<1x2x192xf32>,
    %c0_22 = arith.constant 0 : index
    %c0_23 = arith.constant 0 : index
    %38 = vector.load %arg6[%c0_22, %c0_23] : memref<2x1xi32, #tpu.memory_space<vmem>>, vector<2x1xi32>
    %c0_24 = arith.constant 0 : index
    %c0_25 = arith.constant 0 : index
    %39 = vector.load %arg5[%c0_24, %c0_25] : memref<1x192xf32, #tpu.memory_space<vmem>>, vector<1x192xf32>
    %cst_26 = arith.constant 0.000000e+00 : f32
    %40 = vector.broadcast %cst_26 : f32 to vector<2x64xf32>
    %c0_i32 = arith.constant 0 : i32
    %c4_i32 = arith.constant 4 : i32
    %41 = arith.addi %c0_i32, %c4_i32 : i32
    %c1_i32 = arith.constant 1 : i32
    %42 = scf.for %arg9 = %c0_i32 to %41 step %c1_i32 iter_args(%arg10 = %40) -> (vector<2x64xf32>)  : i32 {
      %c2_i32 = arith.constant 2 : i32
      %43 = arith.muli %c2_i32, %arg9 : i32
      %c7_i32 = arith.constant 7 : i32
      %44 = arith.subi %c7_i32, %43 : i32
      %45 = arith.index_cast %43 : i32 to index
      %c0_28 = arith.constant 0 : index
      %c0_29 = arith.constant 0 : index
      %46 = vector.load %arg8[%45, %c0_28, %c0_29] : memref<8x2x192xf32, #tpu.memory_space<vmem>>, vector<1x2x192xf32>
      %47 = vector.shape_cast %46 : vector<1x2x192xf32> to vector<2x192xf32>
      %48 = arith.index_cast %44 : i32 to index
      %c0_30 = arith.constant 0 : index
      %c0_31 = arith.constant 0 : index
      %49 = vector.load %arg8[%48, %c0_30, %c0_31] : memref<8x2x192xf32, #tpu.memory_space<vmem>>, vector<1x2x192xf32>
      %50 = vector.shape_cast %49 : vector<1x2x192xf32> to vector<2x192xf32>
      %c0_32 = arith.constant 0 : index
      %c0_33 = arith.constant 0 : index
      %51 = vector.load %arg4[%c0_32, %c0_33] : memref<64x192xf32, #tpu.memory_space<vmem>>, vector<64x192xf32>
      %cst_34 = arith.constant dense<0.000000e+00> : vector<2x192xf32>
      %52 = tpu.matmul %arg10, %51, %cst_34 {dimension_numbers = #tpu.dot_dimension_numbers<[1], [0], [0], [1], [0, 0, 1, 1], [], []>} : vector<2x64xf32>, vector<64x192xf32>, vector<2x192xf32> -> vector<2x192xf32>
      %53 = vector.broadcast %39 : vector<1x192xf32> to vector<2x192xf32>
      %54 = arith.addf %52, %53 : vector<2x192xf32>
      %55 = vector.extract_strided_slice %arg10 {offsets = [0, 0], sizes = [2, 32], strides = [1, 1]} : vector<2x64xf32> to vector<2x32xf32>
      %56 = vector.extract_strided_slice %arg10 {offsets = [0, 32], sizes = [2, 32], strides = [1, 1]} : vector<2x64xf32> to vector<2x32xf32>
      %57 = vector.extract_strided_slice %47 {offsets = [0, 0], sizes = [2, 32], strides = [1, 1]} : vector<2x192xf32> to vector<2x32xf32>
      %58 = vector.extract_strided_slice %54 {offsets = [0, 0], sizes = [2, 32], strides = [1, 1]} : vector<2x192xf32> to vector<2x32xf32>
      %59 = arith.addf %57, %58 : vector<2x32xf32>
      %cst_35 = arith.constant 5.000000e-01 : f32
      %60 = vector.broadcast %cst_35 : f32 to vector<2x32xf32>
      %61 = arith.mulf %60, %59 : vector<2x32xf32>
      %62 = math.tanh %61 : vector<2x32xf32>
      %cst_36 = arith.constant 1.000000e+00 : f32
      %63 = vector.broadcast %cst_36 : f32 to vector<2x32xf32>
      %64 = arith.addf %62, %63 : vector<2x32xf32>
      %cst_37 = arith.constant 5.000000e-01 : f32
      %65 = vector.broadcast %cst_37 : f32 to vector<2x32xf32>
      %66 = arith.mulf %65, %64 : vector<2x32xf32>
      %67 = vector.extract_strided_slice %47 {offsets = [0, 32], sizes = [2, 32], strides = [1, 1]} : vector<2x192xf32> to vector<2x32xf32>
      %68 = vector.extract_strided_slice %54 {offsets = [0, 32], sizes = [2, 32], strides = [1, 1]} : vector<2x192xf32> to vector<2x32xf32>
      %69 = arith.addf %67, %68 : vector<2x32xf32>
      %cst_38 = arith.constant 5.000000e-01 : f32
      %70 = vector.broadcast %cst_38 : f32 to vector<2x32xf32>
      %71 = arith.mulf %70, %69 : vector<2x32xf32>
      %72 = math.tanh %71 : vector<2x32xf32>
      %cst_39 = arith.constant 1.000000e+00 : f32
      %73 = vector.broadcast %cst_39 : f32 to vector<2x32xf32>
      %74 = arith.addf %72, %73 : vector<2x32xf32>
      %cst_40 = arith.constant 5.000000e-01 : f32
      %75 = vector.broadcast %cst_40 : f32 to vector<2x32xf32>
      %76 = arith.mulf %75, %74 : vector<2x32xf32>
      %77 = vector.extract_strided_slice %47 {offsets = [0, 64], sizes = [2, 32], strides = [1, 1]} : vector<2x192xf32> to vector<2x32xf32>
      %78 = vector.extract_strided_slice %54 {offsets = [0, 64], sizes = [2, 32], strides = [1, 1]} : vector<2x192xf32> to vector<2x32xf32>
      %79 = arith.mulf %66, %78 : vector<2x32xf32>
      %80 = arith.addf %77, %79 : vector<2x32xf32>
      %81 = math.tanh %80 : vector<2x32xf32>
      %cst_41 = arith.constant 1.000000e+00 : f32
      %82 = vector.broadcast %cst_41 : f32 to vector<2x32xf32>
      %83 = arith.subf %82, %76 : vector<2x32xf32>
      %84 = arith.mulf %83, %81 : vector<2x32xf32>
      %85 = arith.mulf %76, %55 : vector<2x32xf32>
      %86 = arith.addf %84, %85 : vector<2x32xf32>
      %87 = vector.extract_strided_slice %50 {offsets = [0, 96], sizes = [2, 32], strides = [1, 1]} : vector<2x192xf32> to vector<2x32xf32>
      %88 = vector.extract_strided_slice %54 {offsets = [0, 96], sizes = [2, 32], strides = [1, 1]} : vector<2x192xf32> to vector<2x32xf32>
      %89 = arith.addf %87, %88 : vector<2x32xf32>
      %cst_42 = arith.constant 5.000000e-01 : f32
      %90 = vector.broadcast %cst_42 : f32 to vector<2x32xf32>
      %91 = arith.mulf %90, %89 : vector<2x32xf32>
      %92 = math.tanh %91 : vector<2x32xf32>
      %cst_43 = arith.constant 1.000000e+00 : f32
      %93 = vector.broadcast %cst_43 : f32 to vector<2x32xf32>
      %94 = arith.addf %92, %93 : vector<2x32xf32>
      %cst_44 = arith.constant 5.000000e-01 : f32
      %95 = vector.broadcast %cst_44 : f32 to vector<2x32xf32>
      %96 = arith.mulf %95, %94 : vector<2x32xf32>
      %97 = vector.extract_strided_slice %50 {offsets = [0, 128], sizes = [2, 32], strides = [1, 1]} : vector<2x192xf32> to vector<2x32xf32>
      %98 = vector.extract_strided_slice %54 {offsets = [0, 128], sizes = [2, 32], strides = [1, 1]} : vector<2x192xf32> to vector<2x32xf32>
      %99 = arith.addf %97, %98 : vector<2x32xf32>
      %cst_45 = arith.constant 5.000000e-01 : f32
      %100 = vector.broadcast %cst_45 : f32 to vector<2x32xf32>
      %101 = arith.mulf %100, %99 : vector<2x32xf32>
      %102 = math.tanh %101 : vector<2x32xf32>
      %cst_46 = arith.constant 1.000000e+00 : f32
      %103 = vector.broadcast %cst_46 : f32 to vector<2x32xf32>
      %104 = arith.addf %102, %103 : vector<2x32xf32>
      %cst_47 = arith.constant 5.000000e-01 : f32
      %105 = vector.broadcast %cst_47 : f32 to vector<2x32xf32>
      %106 = arith.mulf %105, %104 : vector<2x32xf32>
      %107 = vector.extract_strided_slice %50 {offsets = [0, 160], sizes = [2, 32], strides = [1, 1]} : vector<2x192xf32> to vector<2x32xf32>
      %108 = vector.extract_strided_slice %54 {offsets = [0, 160], sizes = [2, 32], strides = [1, 1]} : vector<2x192xf32> to vector<2x32xf32>
      %109 = arith.mulf %96, %108 : vector<2x32xf32>
      %110 = arith.addf %107, %109 : vector<2x32xf32>
      %111 = math.tanh %110 : vector<2x32xf32>
      %cst_48 = arith.constant 1.000000e+00 : f32
      %112 = vector.broadcast %cst_48 : f32 to vector<2x32xf32>
      %113 = arith.subf %112, %106 : vector<2x32xf32>
      %114 = arith.mulf %113, %111 : vector<2x32xf32>
      %115 = arith.mulf %106, %56 : vector<2x32xf32>
      %116 = arith.addf %114, %115 : vector<2x32xf32>
      %117 = vector.broadcast %43 : i32 to vector<2x1xi32>
      %118 = arith.cmpi slt, %117, %38 : vector<2x1xi32>
      %119 = vector.broadcast %44 : i32 to vector<2x1xi32>
      %120 = arith.cmpi slt, %119, %38 : vector<2x1xi32>
      %cst_49 = arith.constant 0.000000e+00 : f32
      %121 = vector.shape_cast %118 : vector<2x1xi1> to vector<2x1xi1>
      %122 = vector.broadcast %121 : vector<2x1xi1> to vector<2x32xi1>
      %123 = vector.broadcast %cst_49 : f32 to vector<2x32xf32>
      %124 = arith.select %122, %86, %123 : vector<2x32xi1>, vector<2x32xf32>
      %125 = arith.index_cast %43 : i32 to index
      %c0_50 = arith.constant 0 : index
      %c0_51 = arith.constant 0 : index
      %126 = vector.load %arg7[%125, %c0_50, %c0_51] : memref<8x2x64xf32, #tpu.memory_space<vmem>>, vector<1x2x32xf32>
      %127 = vector.shape_cast %126 : vector<1x2x32xf32> to vector<2x32xf32>
      %128 = vector.shape_cast %124 : vector<2x32xf32> to vector<1x2x32xf32>
      tpu.vector_store %arg7[%125, %c0_50, %c0_51], %128 {strides = array<i32>} : memref<8x2x64xf32, #tpu.memory_space<vmem>>, vector<1x2x32xf32>,
      %cst_52 = arith.constant 0.000000e+00 : f32
      %129 = vector.shape_cast %120 : vector<2x1xi1> to vector<2x1xi1>
      %130 = vector.broadcast %129 : vector<2x1xi1> to vector<2x32xi1>
      %131 = vector.broadcast %cst_52 : f32 to vector<2x32xf32>
      %132 = arith.select %130, %116, %131 : vector<2x32xi1>, vector<2x32xf32>
      %133 = arith.index_cast %44 : i32 to index
      %c0_53 = arith.constant 0 : index
      %c32 = arith.constant 32 : index
      %134 = vector.load %arg7[%133, %c0_53, %c32] : memref<8x2x64xf32, #tpu.memory_space<vmem>>, vector<1x2x32xf32>
      %135 = vector.shape_cast %134 : vector<1x2x32xf32> to vector<2x32xf32>
      %136 = vector.shape_cast %132 : vector<2x32xf32> to vector<1x2x32xf32>
      tpu.vector_store %arg7[%133, %c0_53, %c32], %136 {strides = array<i32>} : memref<8x2x64xf32, #tpu.memory_space<vmem>>, vector<1x2x32xf32>,
      %137 = vector.shape_cast %118 : vector<2x1xi1> to vector<2x1xi1>
      %138 = vector.broadcast %137 : vector<2x1xi1> to vector<2x32xi1>
      %139 = arith.select %138, %86, %55 : vector<2x32xi1>, vector<2x32xf32>
      %140 = vector.shape_cast %120 : vector<2x1xi1> to vector<2x1xi1>
      %141 = vector.broadcast %140 : vector<2x1xi1> to vector<2x32xi1>
      %142 = arith.select %141, %116, %56 : vector<2x32xi1>, vector<2x32xf32>
      %143 = tpu.concatenate %139, %142 in 1 : vector<2x32xf32>, vector<2x32xf32> -> vector<2x64xf32>
      %c2_i32_54 = arith.constant 2 : i32
      %144 = arith.muli %c2_i32_54, %arg9 : i32
      %c1_i32_55 = arith.constant 1 : i32
      %145 = arith.addi %144, %c1_i32_55 : i32
      %c7_i32_56 = arith.constant 7 : i32
      %146 = arith.subi %c7_i32_56, %145 : i32
      %147 = arith.index_cast %145 : i32 to index
      %c0_57 = arith.constant 0 : index
      %c0_58 = arith.constant 0 : index
      %148 = vector.load %arg8[%147, %c0_57, %c0_58] : memref<8x2x192xf32, #tpu.memory_space<vmem>>, vector<1x2x192xf32>
      %149 = vector.shape_cast %148 : vector<1x2x192xf32> to vector<2x192xf32>
      %150 = arith.index_cast %146 : i32 to index
      %c0_59 = arith.constant 0 : index
      %c0_60 = arith.constant 0 : index
      %151 = vector.load %arg8[%150, %c0_59, %c0_60] : memref<8x2x192xf32, #tpu.memory_space<vmem>>, vector<1x2x192xf32>
      %152 = vector.shape_cast %151 : vector<1x2x192xf32> to vector<2x192xf32>
      %c0_61 = arith.constant 0 : index
      %c0_62 = arith.constant 0 : index
      %153 = vector.load %arg4[%c0_61, %c0_62] : memref<64x192xf32, #tpu.memory_space<vmem>>, vector<64x192xf32>
      %cst_63 = arith.constant dense<0.000000e+00> : vector<2x192xf32>
      %154 = tpu.matmul %143, %153, %cst_63 {dimension_numbers = #tpu.dot_dimension_numbers<[1], [0], [0], [1], [0, 0, 1, 1], [], []>} : vector<2x64xf32>, vector<64x192xf32>, vector<2x192xf32> -> vector<2x192xf32>
      %155 = vector.broadcast %39 : vector<1x192xf32> to vector<2x192xf32>
      %156 = arith.addf %154, %155 : vector<2x192xf32>
      %157 = vector.extract_strided_slice %143 {offsets = [0, 0], sizes = [2, 32], strides = [1, 1]} : vector<2x64xf32> to vector<2x32xf32>
      %158 = vector.extract_strided_slice %143 {offsets = [0, 32], sizes = [2, 32], strides = [1, 1]} : vector<2x64xf32> to vector<2x32xf32>
      %159 = vector.extract_strided_slice %149 {offsets = [0, 0], sizes = [2, 32], strides = [1, 1]} : vector<2x192xf32> to vector<2x32xf32>
      %160 = vector.extract_strided_slice %156 {offsets = [0, 0], sizes = [2, 32], strides = [1, 1]} : vector<2x192xf32> to vector<2x32xf32>
      %161 = arith.addf %159, %160 : vector<2x32xf32>
      %cst_64 = arith.constant 5.000000e-01 : f32
      %162 = vector.broadcast %cst_64 : f32 to vector<2x32xf32>
      %163 = arith.mulf %162, %161 : vector<2x32xf32>
      %164 = math.tanh %163 : vector<2x32xf32>
      %cst_65 = arith.constant 1.000000e+00 : f32
      %165 = vector.broadcast %cst_65 : f32 to vector<2x32xf32>
      %166 = arith.addf %164, %165 : vector<2x32xf32>
      %cst_66 = arith.constant 5.000000e-01 : f32
      %167 = vector.broadcast %cst_66 : f32 to vector<2x32xf32>
      %168 = arith.mulf %167, %166 : vector<2x32xf32>
      %169 = vector.extract_strided_slice %149 {offsets = [0, 32], sizes = [2, 32], strides = [1, 1]} : vector<2x192xf32> to vector<2x32xf32>
      %170 = vector.extract_strided_slice %156 {offsets = [0, 32], sizes = [2, 32], strides = [1, 1]} : vector<2x192xf32> to vector<2x32xf32>
      %171 = arith.addf %169, %170 : vector<2x32xf32>
      %cst_67 = arith.constant 5.000000e-01 : f32
      %172 = vector.broadcast %cst_67 : f32 to vector<2x32xf32>
      %173 = arith.mulf %172, %171 : vector<2x32xf32>
      %174 = math.tanh %173 : vector<2x32xf32>
      %cst_68 = arith.constant 1.000000e+00 : f32
      %175 = vector.broadcast %cst_68 : f32 to vector<2x32xf32>
      %176 = arith.addf %174, %175 : vector<2x32xf32>
      %cst_69 = arith.constant 5.000000e-01 : f32
      %177 = vector.broadcast %cst_69 : f32 to vector<2x32xf32>
      %178 = arith.mulf %177, %176 : vector<2x32xf32>
      %179 = vector.extract_strided_slice %149 {offsets = [0, 64], sizes = [2, 32], strides = [1, 1]} : vector<2x192xf32> to vector<2x32xf32>
      %180 = vector.extract_strided_slice %156 {offsets = [0, 64], sizes = [2, 32], strides = [1, 1]} : vector<2x192xf32> to vector<2x32xf32>
      %181 = arith.mulf %168, %180 : vector<2x32xf32>
      %182 = arith.addf %179, %181 : vector<2x32xf32>
      %183 = math.tanh %182 : vector<2x32xf32>
      %cst_70 = arith.constant 1.000000e+00 : f32
      %184 = vector.broadcast %cst_70 : f32 to vector<2x32xf32>
      %185 = arith.subf %184, %178 : vector<2x32xf32>
      %186 = arith.mulf %185, %183 : vector<2x32xf32>
      %187 = arith.mulf %178, %157 : vector<2x32xf32>
      %188 = arith.addf %186, %187 : vector<2x32xf32>
      %189 = vector.extract_strided_slice %152 {offsets = [0, 96], sizes = [2, 32], strides = [1, 1]} : vector<2x192xf32> to vector<2x32xf32>
      %190 = vector.extract_strided_slice %156 {offsets = [0, 96], sizes = [2, 32], strides = [1, 1]} : vector<2x192xf32> to vector<2x32xf32>
      %191 = arith.addf %189, %190 : vector<2x32xf32>
      %cst_71 = arith.constant 5.000000e-01 : f32
      %192 = vector.broadcast %cst_71 : f32 to vector<2x32xf32>
      %193 = arith.mulf %192, %191 : vector<2x32xf32>
      %194 = math.tanh %193 : vector<2x32xf32>
      %cst_72 = arith.constant 1.000000e+00 : f32
      %195 = vector.broadcast %cst_72 : f32 to vector<2x32xf32>
      %196 = arith.addf %194, %195 : vector<2x32xf32>
      %cst_73 = arith.constant 5.000000e-01 : f32
      %197 = vector.broadcast %cst_73 : f32 to vector<2x32xf32>
      %198 = arith.mulf %197, %196 : vector<2x32xf32>
      %199 = vector.extract_strided_slice %152 {offsets = [0, 128], sizes = [2, 32], strides = [1, 1]} : vector<2x192xf32> to vector<2x32xf32>
      %200 = vector.extract_strided_slice %156 {offsets = [0, 128], sizes = [2, 32], strides = [1, 1]} : vector<2x192xf32> to vector<2x32xf32>
      %201 = arith.addf %199, %200 : vector<2x32xf32>
      %cst_74 = arith.constant 5.000000e-01 : f32
      %202 = vector.broadcast %cst_74 : f32 to vector<2x32xf32>
      %203 = arith.mulf %202, %201 : vector<2x32xf32>
      %204 = math.tanh %203 : vector<2x32xf32>
      %cst_75 = arith.constant 1.000000e+00 : f32
      %205 = vector.broadcast %cst_75 : f32 to vector<2x32xf32>
      %206 = arith.addf %204, %205 : vector<2x32xf32>
      %cst_76 = arith.constant 5.000000e-01 : f32
      %207 = vector.broadcast %cst_76 : f32 to vector<2x32xf32>
      %208 = arith.mulf %207, %206 : vector<2x32xf32>
      %209 = vector.extract_strided_slice %152 {offsets = [0, 160], sizes = [2, 32], strides = [1, 1]} : vector<2x192xf32> to vector<2x32xf32>
      %210 = vector.extract_strided_slice %156 {offsets = [0, 160], sizes = [2, 32], strides = [1, 1]} : vector<2x192xf32> to vector<2x32xf32>
      %211 = arith.mulf %198, %210 : vector<2x32xf32>
      %212 = arith.addf %209, %211 : vector<2x32xf32>
      %213 = math.tanh %212 : vector<2x32xf32>
      %cst_77 = arith.constant 1.000000e+00 : f32
      %214 = vector.broadcast %cst_77 : f32 to vector<2x32xf32>
      %215 = arith.subf %214, %208 : vector<2x32xf32>
      %216 = arith.mulf %215, %213 : vector<2x32xf32>
      %217 = arith.mulf %208, %158 : vector<2x32xf32>
      %218 = arith.addf %216, %217 : vector<2x32xf32>
      %219 = vector.broadcast %145 : i32 to vector<2x1xi32>
      %220 = arith.cmpi slt, %219, %38 : vector<2x1xi32>
      %221 = vector.broadcast %146 : i32 to vector<2x1xi32>
      %222 = arith.cmpi slt, %221, %38 : vector<2x1xi32>
      %cst_78 = arith.constant 0.000000e+00 : f32
      %223 = vector.shape_cast %220 : vector<2x1xi1> to vector<2x1xi1>
      %224 = vector.broadcast %223 : vector<2x1xi1> to vector<2x32xi1>
      %225 = vector.broadcast %cst_78 : f32 to vector<2x32xf32>
      %226 = arith.select %224, %188, %225 : vector<2x32xi1>, vector<2x32xf32>
      %227 = arith.index_cast %145 : i32 to index
      %c0_79 = arith.constant 0 : index
      %c0_80 = arith.constant 0 : index
      %228 = vector.load %arg7[%227, %c0_79, %c0_80] : memref<8x2x64xf32, #tpu.memory_space<vmem>>, vector<1x2x32xf32>
      %229 = vector.shape_cast %228 : vector<1x2x32xf32> to vector<2x32xf32>
      %230 = vector.shape_cast %226 : vector<2x32xf32> to vector<1x2x32xf32>
      tpu.vector_store %arg7[%227, %c0_79, %c0_80], %230 {strides = array<i32>} : memref<8x2x64xf32, #tpu.memory_space<vmem>>, vector<1x2x32xf32>,
      %cst_81 = arith.constant 0.000000e+00 : f32
      %231 = vector.shape_cast %222 : vector<2x1xi1> to vector<2x1xi1>
      %232 = vector.broadcast %231 : vector<2x1xi1> to vector<2x32xi1>
      %233 = vector.broadcast %cst_81 : f32 to vector<2x32xf32>
      %234 = arith.select %232, %218, %233 : vector<2x32xi1>, vector<2x32xf32>
      %235 = arith.index_cast %146 : i32 to index
      %c0_82 = arith.constant 0 : index
      %c32_83 = arith.constant 32 : index
      %236 = vector.load %arg7[%235, %c0_82, %c32_83] : memref<8x2x64xf32, #tpu.memory_space<vmem>>, vector<1x2x32xf32>
      %237 = vector.shape_cast %236 : vector<1x2x32xf32> to vector<2x32xf32>
      %238 = vector.shape_cast %234 : vector<2x32xf32> to vector<1x2x32xf32>
      tpu.vector_store %arg7[%235, %c0_82, %c32_83], %238 {strides = array<i32>} : memref<8x2x64xf32, #tpu.memory_space<vmem>>, vector<1x2x32xf32>,
      %239 = vector.shape_cast %220 : vector<2x1xi1> to vector<2x1xi1>
      %240 = vector.broadcast %239 : vector<2x1xi1> to vector<2x32xi1>
      %241 = arith.select %240, %188, %157 : vector<2x32xi1>, vector<2x32xf32>
      %242 = vector.shape_cast %222 : vector<2x1xi1> to vector<2x1xi1>
      %243 = vector.broadcast %242 : vector<2x1xi1> to vector<2x32xi1>
      %244 = arith.select %243, %218, %158 : vector<2x32xi1>, vector<2x32xf32>
      %245 = tpu.concatenate %241, %244 in 1 : vector<2x32xf32>, vector<2x32xf32> -> vector<2x64xf32>
      scf.yield %245 : vector<2x64xf32>
    }
    %c4_i32_27 = arith.constant 4 : i32
    return
  }
  func.func @transform_0(%arg0: i32) -> (i32, i32) {
    %c0_i32 = arith.constant 0 : i32
    %c0_i32_0 = arith.constant 0 : i32
    %c0_i32_1 = arith.constant 0 : i32
    return %c0_i32, %c0_i32_0 : i32, i32
  }
  func.func @transform_1(%arg0: i32) -> (i32, i32) {
    %c0_i32 = arith.constant 0 : i32
    %c0_i32_0 = arith.constant 0 : i32
    %c0_i32_1 = arith.constant 0 : i32
    return %c0_i32, %c0_i32_0 : i32, i32
  }
  func.func @transform_2(%arg0: i32) -> (i32, i32) {
    %c0_i32 = arith.constant 0 : i32
    %c0_i32_0 = arith.constant 0 : i32
    %c0_i32_1 = arith.constant 0 : i32
    return %c0_i32, %c0_i32_0 : i32, i32
  }
  func.func @transform_3(%arg0: i32) -> (i32, i32) {
    %c0_i32 = arith.constant 0 : i32
    %c0_i32_0 = arith.constant 0 : i32
    %c0_i32_1 = arith.constant 0 : i32
    return %c0_i32, %c0_i32_0 : i32, i32
  }
  func.func @transform_4(%arg0: i32) -> (i32, i32) {
    %c0_i32 = arith.constant 0 : i32
    %c0_i32_0 = arith.constant 0 : i32
    %c0_i32_1 = arith.constant 0 : i32
    return %c0_i32, %c0_i32_0 : i32, i32
  }
  func.func @transform_5(%arg0: i32) -> (i32, i32) {
    %c0_i32 = arith.constant 0 : i32
    %c0_i32_0 = arith.constant 0 : i32
    %c0_i32_1 = arith.constant 0 : i32
    return %c0_i32, %c0_i32_0 : i32, i32
  }
  func.func @transform_6(%arg0: i32) -> (i32, i32, i32) {
    %c0_i32 = arith.constant 0 : i32
    %c0_i32_0 = arith.constant 0 : i32
    %c0_i32_1 = arith.constant 0 : i32
    %c0_i32_2 = arith.constant 0 : i32
    return %c0_i32, %c0_i32_0, %c0_i32_1 : i32, i32, i32
  }
}

</mosaic_0001>

<bundles_post_ra>
// kernel: tpu_custom_call.1
= control target key start
LH: loop header
LB: loop body
LE: loop exit
PB: predicated region body
PF: predicated region fallthrough
CT: control target
= control target key end

     0   :  { %11 = vsyncpa [#allocation4], 0  ;;  %s1029_s0 = inlined_call_operand.hbm [shape: f32[16,32], index: 0, kind: input, shape index: {}]   ;;  %s1030_s1 = inlined_call_operand.hbm [shape: f32[32,192], index: 1, kind: input, shape index: {}]   ;;  %s1031_s2 = inlined_call_operand.vmem [shape: f32[1,192], index: 2, kind: input, shape index: {}]   ;;  %s1032_s3 = inlined_call_operand.hbm [shape: f32[64,192], index: 3, kind: input, shape index: {}]   ;;  %s1033_s4 = inlined_call_operand.vmem [shape: f32[1,192], index: 4, kind: input, shape index: {}]   ;;  %s1034_s5 = inlined_call_operand.vmem [shape: s32[2,1], index: 5, kind: input, shape index: {}]   ;;  %s1035_s6 = inlined_call_operand.hbm [shape: f32[8,2,64], index: 6, kind: output, shape index: {}]  }
   0x1   :  { %12 = vsyncpa [#allocation7], 0  ;;  %s31_s23 = sshll.u32 %s1030_s1, 4  ;;  %s32_s23 = int_to_ptr.hbm [resolvable:$true] %s31_s23 }
   0x2   :  { %13 = vsyncpa [#allocation5], 0  ;;  %s814_s24 = smov [#allocation6]   ;;  %s18_s28 = sshll.u32 %s1029_s0, 4  ;;  %s19_s28 = int_to_ptr.hbm [resolvable:$true] %s18_s28 }
   0x3   :  { %s33_s25 = sshll.u32 %s814_s24, 4  ;;  %s815_s29 = smov 256   ;;  %s34_s25 = int_to_ptr.vmem [resolvable:$true] %s33_s25 }
   0x4   :  { %s816_s30 = smov 16   ;;  %s817_s7 = smov [#allocation3]  }
   0x5   :  { %39 = dma.hbm_to_vmem [thread:$0]  %s32_s23, 1024, %s34_s25, [#allocation7], %s815_s29, %s815_s29, %s816_s30  }
   0x6   :  { %s20_s8 = sshll.u32 %s817_s7, 4  ;;  %s818_s9 = smov 128   ;;  %s21_s8 = int_to_ptr.vmem [resolvable:$true] %s20_s8 }
   0x7   :  { %s819_s10 = smov 8   ;;  %s46_s12 = sshll.u32 %s1032_s3, 4  ;;  %s47_s12 = int_to_ptr.hbm [resolvable:$true] %s46_s12 }
   0x8   :  { %26 = dma.hbm_to_vmem [thread:$0]  %s19_s28, 256, %s21_s8, [#allocation4], %s818_s9, %s818_s9, %s819_s10  }
   0x9   :  { %s820_s13 = smov [#allocation8]  }
   0xa   :  { %s48_s14 = sshll.u32 %s820_s13, 4  ;;  %s49_s14 = int_to_ptr.vmem [resolvable:$true] %s48_s14 }
   0xb   :  { %54 = dma.hbm_to_vmem [thread:$0]  %s47_s12, 2048, %s49_s14, [#allocation7], %s815_s29, %s815_s29, %s816_s30  }
   0xc   :  { %800 = dma.done.wait [#allocation4], 256  }
   0xd   :  { %801 = vsyncadd [#allocation4], 4294967040 }
   0xe   :  { %802 = dma.done.wait [#allocation7], 3072  }
   0xf   :  { %803 = vsyncadd [#allocation7], 4294964224  ;;  %v875_v0 = vld [vmem:[%s1034_s5] sm:$0x3]  ;;  %v79_v2 = vld [vmem:[#allocation6 + $0x30] sm:$0xff]  ;;  %vm87_vm0 = vcmask 261120  }
  0x10   :  { %v880_v1 = vld [vmem:[%s1033_s4] sm:$0x3]  ;;  %106 = vmatpush.msra.mxu0 %v79_v2  ;;  %v80_v3 = vld [vmem:[#allocation6 + $0x38] sm:$0xff]  ;;  %v77_v4 = vld [vmem:[#allocation6 + $0x20] sm:$0xff]  ;;  %636 = vmatpush.msra.mxu2 %v79_v2  ;;  %vm143_vm1 = vcmask 1041408   ;;  %vm146_vm2 = vcmask 519170  }
  0x11   :  { %v78_v5 = vld [vmem:[#allocation6 + $0x28] sm:$0xff]  ;;  %129 = vmatpush.msra.mxu1 %v80_v3  ;;  %v75_v6 = vld [vmem:[#allocation6 + $0x10] sm:$0xff]  ;;  %640 = vmatpush.msra.mxu3 %v80_v3  ;;  %v76_v7 = vld [vmem:[#allocation6 + $0x18] sm:$0xff]  ;;  %v912_v34 = vmov 0.0  }
  0x12   :  { %107 = vmatpush.msra.mxu0 %v77_v4  ;;  %637 = vmatpush.msra.mxu2 %v77_v4  ;;  %v73_v8 = vld [vmem:[#allocation6] sm:$0xff]  ;;  %v74_v9 = vld [vmem:[#allocation6 + $0x8] sm:$0xff]  ;;  %v71_v10 = vld [vmem:[#allocation3] sm:$0xff] }
  0x13   :  { %130 = vmatpush.msra.mxu1 %v78_v5  ;;  %641 = vmatpush.msra.mxu3 %v78_v5  ;;  %v72_v11 = vld [vmem:[#allocation3 + $0x8] sm:$0xff]  ;;  %v81_v12 = vld [vmem:[%s1031_s2] sm:$0x3]  ;;  %vm890_vm3 = vmor %vm146_vm2, %vm143_vm1  ;;  %s914_s2 = smov 0  }
  0x14   :  { %108 = vmatpush.msra.mxu0 %v75_v6  ;;  %638 = vmatpush.msra.mxu2 %v75_v6  ;;  %v83_v13 = vperm.slane %v81_v12, 0  ;;  %v84_v14 = vperm.slane %v81_v12, 1 }
  0x15   :  { %131 = vmatpush.msra.mxu1 %v76_v7  ;;  %642 = vmatpush.msra.mxu3 %v76_v7 }
  0x16   :  { %109 = vmatpush.msra.mxu0 %v73_v8  ;;  %639 = vmatpush.msra.mxu2 %v73_v8 }
  0x17   :  { %132 = vmatpush.msra.mxu1 %v74_v9  ;;  %609 = vmatmul.msk.f32.vlgmr.msra.gmra.mxu0 %vm87_vm0, %v71_v10 }
  0x18   :  { %611 = vmatmul.msk.f32.vlgmr.msra.gmra.mxu1 %vm87_vm0, %v71_v10  ;;  %643 = vmatpush.msra.mxu3 %v74_v9 }
  0x19   :  { %612 = vmatmul.msk.f32.vlgmr.msra.gmra.mxu3 %vm87_vm0, %v72_v11  ;;  %610 = vmatmul.msk.f32.vlgmr.msra.gmra.mxu2 %vm87_vm0, %v72_v11 }
  0x94   :  { %v111_v15 = vpop.f32.mrf.mxu0 }
  0x95   :  { %v112_v16 = vadd.f32 %v111_v15, %v83_v13  ;;  %v134_v17 = vpop.f32.mrf.mxu1 }
  0x96   :  { %v135_v18 = vadd.f32 %v134_v17, %v84_v14 }
  0x97   :  { %149 = vst.sshfl [vmem:[#allocation1] sm:$0xff pattern:$0x73625140] %v112_v16 }
  0x98   :  { %v142_v19 = vrot.slane %v135_v18, 6  ;;  %150 = vst.sshfl [vmem:[#allocation1 + $0x8] sm:$0xff pattern:$0x73625140] %v135_v18 }
  0x9a   :  { %v144_v21 = vsel %vm143_vm1, %v112_v16, %v142_v19 }
  0x9b   :  { %148 = vst.msk [vmem:[#allocation2] sm:$0xf] %vm890_vm3, %v144_v21 }
  0x9c   :  { %v137_v22 = vpop.f32.mrf.mxu3  ;;  %v114_v23 = vpop.f32.mrf.mxu2 }
  0x9d   :  { %v138_v24 = vadd.f32 %v137_v22, %v84_v14  ;;  %v115_v25 = vadd.f32 %v114_v23, %v83_v13 }
  0x9f   :  { %v152_v26 = vld [vmem:[#allocation1 + $0x1] ss:$4 sm:$0xff]  ;;  %v172_v27 = vrot.slane %v138_v24, 6 }
  0xa0   :  { %156 = vst.sshfl [vmem:[#allocation1] sm:$0xff pattern:$0x73625140] %v112_v16 }
  0xa1   :  { %157 = vst.sshfl [vmem:[#allocation1 + $0x8] sm:$0xff pattern:$0x73625140] %v135_v18  ;;  %v173_v28 = vsel %vm143_vm1, %v115_v25, %v172_v27 }
  0xa2   :  { %155 = vst.msk [vmem:[#allocation2 + $0x4] sm:$0xf] %vm890_vm3, %v152_v26 }
  0xa3   :  { %176 = vst.msk [vmem:[#allocation2 + $0x10] sm:$0xf] %vm890_vm3, %v173_v28 }
  0xa8   :  { %v159_v29 = vld [vmem:[#allocation1 + $0x2] ss:$4 sm:$0xff] }
  0xa9   :  { %163 = vst.sshfl [vmem:[#allocation1] sm:$0xff pattern:$0x73625140] %v112_v16 }
  0xaa   :  { %164 = vst.sshfl [vmem:[#allocation1 + $0x8] sm:$0xff pattern:$0x73625140] %v135_v18 }
  0xab   :  { %162 = vst.msk [vmem:[#allocation2 + $0x8] sm:$0xf] %vm890_vm3, %v159_v29 }
  0xb1   :  { %v166_v30 = vld [vmem:[#allocation1 + $0x3] ss:$4 sm:$0xff] }
  0xb2   :  { %178 = vst.sshfl [vmem:[#allocation1 + $0x8] sm:$0xff pattern:$0x73625140] %v138_v24 }
  0xb3   :  { %169 = vst.msk [vmem:[#allocation2 + $0xc] sm:$0xf] %vm890_vm3, %v166_v30 }
  0xb4   :  { %177 = vst.sshfl [vmem:[#allocation1] sm:$0xff pattern:$0x73625140] %v115_v25 }
  0xbb   :  { %v180_v31 = vld [vmem:[#allocation1 + $0x1] ss:$4 sm:$0xff] }
  0xbc   :  { %183 = vst.msk [vmem:[#allocation2 + $0x14] sm:$0xf] %vm890_vm3, %v180_v31 }
  0xbd   :  { %184 = vst.sshfl [vmem:[#allocation1] sm:$0xff pattern:$0x73625140] %v115_v25 }
  0xbe   :  { %185 = vst.sshfl [vmem:[#allocation1 + $0x8] sm:$0xff pattern:$0x73625140] %v138_v24 }
  0xc5   :  { %v187_v32 = vld [vmem:[#allocation1 + $0x2] ss:$4 sm:$0xff] }
  0xc6   :  { %190 = vst.msk [vmem:[#allocation2 + $0x18] sm:$0xf] %vm890_vm3, %v187_v32 }
  0xc7   :  { %191 = vst.sshfl [vmem:[#allocation1] sm:$0xff pattern:$0x73625140] %v115_v25 }
  0xc8   :  { %192 = vst.sshfl [vmem:[#allocation1 + $0x8] sm:$0xff pattern:$0x73625140] %v138_v24 }
  0xcf   :  { %v194_v33 = vld [vmem:[#allocation1 + $0x3] ss:$4 sm:$0xff] }
  0xd0   :  { %197 = vst.msk [vmem:[#allocation2 + $0x1c] sm:$0xf] %vm890_vm3, %v194_v33 }
  0xd1 LB: > { %v231_v35 = vld [vmem:[#allocation8 + $0x70] sm:$0xff]  ;;  %v232_v36 = vld [vmem:[#allocation8 + $0x78] sm:$0xff]  ;;  %v229_v37 = vld [vmem:[#allocation8 + $0x60] sm:$0xff]  ;;  %s821_s5 = smov 32   ;;  %vm238_vm4 = vcmask 523264   ;;  %s929_s18 = sshll.u32 %s812_s2, 1  ;;  %s812_s2 = sphi %s914_s2, %s205_s2   ;;  %v808_v34 = vphi %v912_v34, %v560_v34  }
  0xd2   : > { %250 = vmatpush.msra.mxu0 %v231_v35  ;;  %270 = vmatpush.msra.mxu1 %v232_v36  ;;  %v230_v38 = vld [vmem:[#allocation8 + $0x68] sm:$0xff]  ;;  %v227_v39 = vld [vmem:[#allocation8 + $0x50] sm:$0xff]  ;;  %v228_v40 = vld [vmem:[#allocation8 + $0x58] sm:$0xff]  ;;  %s932_s19 = ssub.s32 7, %s929_s18  ;;  %v234_v51 = vperm.slane %v880_v1, 0  ;;  %v235_v52 = vperm.slane %v880_v1, 1  ;;  %v344_v20 = vstv %s929_s18 }
  0xd3   : > { %304 = vrot.lane.b32.xlu2 %v808_v34, %s821_s5  ;;  %425 = vmatpush.msra.mxu2 %v231_v35  ;;  %v225_v41 = vld [vmem:[#allocation8 + $0x40] sm:$0xff]  ;;  %v226_v42 = vld [vmem:[#allocation8 + $0x48] sm:$0xff]  ;;  %v223_v43 = vld [vmem:[#allocation8 + $0x30] sm:$0xff]  ;;  %s632_s20 = sshll.u32 %s932_s19, 2  ;;  %s822_s22 = smov 96   ;;  %v346_v13 = vstv %s932_s19  ;;  %v824_v14 = vmov 0   ;;  %vm345_vm6 = vcmp.lt.s32.totalorder %v344_v20, %v875_v0 }
  0xd4   : > { %251 = vmatpush.msra.mxu0 %v229_v37  ;;  %271 = vmatpush.msra.mxu1 %v230_v38  ;;  %v224_v44 = vld [vmem:[#allocation8 + $0x38] sm:$0xff]  ;;  %v221_v45 = vld [vmem:[#allocation8 + $0x20] sm:$0xff]  ;;  %v222_v46 = vld [vmem:[#allocation8 + $0x28] sm:$0xff]  ;;  %s215_s21 = scalar_lea.vmem [#allocation2], %s632_s20  ;;  %s823_s23 = smov 64   ;;  %vm347_vm5 = vcmp.lt.s32.totalorder %v346_v13, %v875_v0  ;;  %v348_v21 = vsel %vm345_vm6, 1, %v824_v14 }
  0xd5   : > { %445 = vmatpush.msra.mxu3 %v232_v36  ;;  %426 = vmatpush.msra.mxu2 %v229_v37  ;;  %v219_v47 = vld [vmem:[#allocation8 + $0x10] sm:$0xff]  ;;  %v220_v48 = vld [vmem:[#allocation8 + $0x18] sm:$0xff]  ;;  %v217_v49 = vld [vmem:[#allocation8] sm:$0xff]  ;;  %s631_s24 = sshll.u32 %s812_s2, 3  ;;  %v363_v15 = vsel %vm347_vm5, 1, %v824_v14  ;;  %s979_s26 = ssub.s32 6, %s929_s18 }
  0xd6   : > { %252 = vmatpush.msra.mxu0 %v227_v39  ;;  %272 = vmatpush.msra.mxu1 %v228_v40  ;;  %v218_v50 = vld [vmem:[#allocation8 + $0x8] sm:$0xff]  ;;  %s945_s25 = scalar_lea.vmem [#allocation2], %s631_s24  ;;  %s634_s27 = sshll.u32 %s979_s26, 2  ;;  %vm361_vm11 = vcmask 254976   ;;  %vm374_vm12 = vcmask 517376  }
  0xd7   : > { %446 = vmatpush.msra.mxu3 %v230_v38  ;;  %427 = vmatpush.msra.mxu2 %v227_v39  ;;  %v216_v53 = vld [vmem:[%s215_s21] sm:$0xf]  ;;  %s396_s28 = scalar_lea.vmem [#allocation2], %s634_s27  ;;  %s388_s29 = sadd.s32 1, %s929_s18 }
  0xd8   : > { %253 = vmatpush.msra.mxu0 %v225_v41  ;;  %273 = vmatpush.msra.mxu1 %v226_v42  ;;  %v315_v54 = vrot.slane %v216_v53, 2  ;;  %v212_v61 = vld [vmem:[%s945_s25] sm:$0xf]  ;;  %s630_s30 = sshll.u32 %s812_s2, 2  ;;  %s616_s7 = sshll.u32 %s932_s19, 1 }
  0xd9   : > { %447 = vmatpush.msra.mxu3 %v228_v40  ;;  %428 = vmatpush.msra.mxu2 %v225_v41  ;;  %s360_s8 = scalar_lea.vmem [#allocation9], %s630_s30  ;;  %s373_s9 = scalar_lea.vmem [#allocation9], %s616_s7 }
  0xda   : > { %254 = vmatpush.msra.mxu0 %v223_v43  ;;  %274 = vmatpush.msra.mxu1 %v224_v44  ;;  %s623_s10 = sshll.u32 %s979_s26, 1  ;;  %s205_s2 = sadd.s32 1, %s812_s2  }
  0xdb   : > { %448 = vmatpush.msra.mxu3 %v226_v42  ;;  %429 = vmatpush.msra.mxu2 %v223_v43  ;;  %s547_s1 = scalar_lea.vmem [#allocation9], %s623_s10  ;;  %p202_p0 = scmp.ge.s32.totalorder %s205_s2, 4  }
  0xdc   : > { %255 = vmatpush.msra.mxu0 %v221_v45  ;;  %275 = vmatpush.msra.mxu1 %v222_v46  ;;  %s567_s13 = sshll.u32 (%p202_p0), %s1035_s6, 4  ;;  %s825_s14 = smov (%p202_p0), [#allocation9]   ;;  %s568_s13 = int_to_ptr.hbm [resolvable:$true] %s567_s13 }
  0xdd   : > { %449 = vmatpush.msra.mxu3 %v224_v44  ;;  %430 = vmatpush.msra.mxu2 %v221_v45  ;;  %s565_s0 = sshll.u32 (%p202_p0), %s825_s14, 4  ;;  %s826_s15 = smov (%p202_p0), 32   ;;  %s566_s0 = int_to_ptr.vmem [resolvable:$true] %s565_s0 }
  0xde   : > { %256 = vmatpush.msra.mxu0 %v219_v47  ;;  %276 = vmatpush.msra.mxu1 %v220_v48  ;;  %s827_s16 = smov (%p202_p0), 2  }
  0xdf   : > { %450 = vmatpush.msra.mxu3 %v222_v46  ;;  %431 = vmatpush.msra.mxu2 %v219_v47 }
  0xe0   : > { %257 = vmatpush.msra.mxu0 %v217_v49  ;;  %277 = vmatpush.msra.mxu1 %v218_v50 }
  0xe1   : > { %618 = vmatmul.msk.f32.vlgmr.msra.gmra.mxu0 %vm238_vm4, %v808_v34  ;;  %619 = vmatmul.msk.f32.vlgmr.msra.gmra.mxu1 %vm238_vm4, %v808_v34 }
  0xe2   : > { %451 = vmatpush.msra.mxu3 %v220_v48  ;;  %432 = vmatpush.msra.mxu2 %v217_v49 }
  0xe3   : > { %327 = vrot.lane.b32.xlu2 %v216_v53, %s822_s22  ;;  %675 = vset.pattern.permute.xlu0 %v824_v14 }
  0xe4   : > { %452 = vmatpush.msra.mxu3 %v218_v50  ;;  %674 = vset.pattern.permute.xlu2 %v824_v14 }
  0xeb   : > { %365 = vperm.xlu2 %674, %v363_v15  }
 0x12d   : > { %v305_v19 = vpop.permute.xlu2 %304 }
 0x13d   : > { %v328_v23 = vpop.permute.xlu2 %327 }
 0x13e   : > { %v329_v24 = vrot.slane %v328_v23, 2 }
 0x145   : > { %v366_v38 = vpop.permute.xlu2 %365 }
 0x146   : > { %vm367_vm7 = vcmp.eq.s32.totalorder %v366_v38, 1 }
 0x15e   : > { %v259_v55 = vpop.f32.mrf.mxu0  ;;  %v279_v56 = vpop.f32.mrf.mxu1 }
 0x15f   : > { %v260_v57 = vadd.f32 %v259_v55, %v234_v51  ;;  %v280_v58 = vadd.f32 %v279_v56, %v235_v52 }
 0x161   : > { %v309_v59 = vadd.f32 %v260_v57, %v216_v53  ;;  %v317_v60 = vadd.f32 %v315_v54, %v280_v58  ;;  %323 = vrot.lane.b32.xlu1 %v280_v58, %s823_s23  ;;  %288 = vrot.lane.b32.xlu0 %v260_v57, %s823_s23  ;;  %v282_v62 = vadd.f32 %v260_v57, %v212_v61  ;;  %v397_v54 = vld [vmem:[%s396_s28] sm:$0xf] }
 0x162   : > { %v490_v55 = vrot.slane %v397_v54, 2 }
 0x163   : > { %v283_v63 = vmul.f32 0.5, %v282_v62  ;;  %v310_v2 = vmul.f32 0.5, %v309_v59  ;;  %v318_v22 = vmul.f32 0.5, %v317_v60 }
 0x165   : > { %676 = vtanh.f32 %v283_v63 }
 0x166   : > { %678 = vtanh.f32 %v310_v2 }
 0x16b   : > { %v677_v3 = vpop.eup %676 }
 0x16c   : > { %v285_v4 = vadd.f32 1.0, %v677_v3  ;;  %v679_v6 = vpop.eup %678 }
 0x16d   : > { %v312_v9 = vadd.f32 1.0, %v679_v6 }
 0x16e   : > { %v286_v5 = vmul.f32 0.5, %v285_v4 }
 0x16f   : > { %v313_v11 = vmul.f32 0.5, %v312_v9 }
 0x170   : > { %v298_v28 = vsub.f32 1.0, %v286_v5  ;;  %v307_v31 = vmul.f32 %v305_v19, %v286_v5 }
 0x1d3   : > { %v289_v7 = vpop.permute.xlu0 %288  ;;  %v324_v10 = vpop.permute.xlu1 %323 }
 0x1d4   : > { %v291_v8 = vmul.f32 %v289_v7, %v286_v5  ;;  %v326_v12 = vmul.f32 %v324_v10, %v313_v11  ;;  %v519_v7 = vstv %s388_s29 }
 0x1d5   : > { %vm520_vm10 = vcmp.lt.s32.totalorder %v519_v7, %v875_v0 }
 0x1d6   : > { %293 = vrot.lane.b32.xlu0 %v291_v8, %s823_s23  ;;  %v523_v8 = vsel %vm520_vm10, 1, %v824_v14 }
 0x1de   : > { %332 = vrot.lane.b32.xlu0 %v326_v12, %s821_s5 }
 0x1e6   : > { %350 = vperm.xlu0 %675, %v348_v21  }
 0x248   : > { %v294_v16 = vpop.permute.xlu0 %293 }
 0x249   : > { %v296_v17 = vadd.f32 %v294_v16, %v212_v61  ;;  %v521_v61 = vstv %s979_s26 }
 0x24a   : > { %vm522_vm9 = vcmp.lt.s32.totalorder %v521_v61, %v875_v0 }
 0x24b   : > { %680 = vtanh.f32 %v296_v17  ;;  %v537_v62 = vsel %vm522_vm9, 1, %v824_v14 }
 0x24c   : > { %682 = vtanh.f32 %v318_v22 }
 0x250   : > { %v333_v25 = vpop.permute.xlu0 %332 }
 0x251   : > { %v681_v18 = vpop.eup %680  ;;  %v335_v27 = vadd.f32 %v333_v25, %v329_v24 }
 0x252   : > { %300 = vrot.lane.b32.xlu1 %v681_v18, %s822_s22  ;;  %v683_v26 = vpop.eup %682 }
 0x253   : > { %v320_v29 = vadd.f32 1.0, %v683_v26  ;;  %684 = vtanh.f32 %v335_v27 }
 0x255   : > { %v321_v35 = vmul.f32 0.5, %v320_v29 }
 0x257   : > { %v337_v37 = vsub.f32 1.0, %v321_v35 }
 0x258   : > { %v965_v47 = vpop.permute.xlu0 %350 }
 0x259   : > { %v685_v36 = vpop.eup %684  ;;  %vm352_vm8 = vcmp.eq.s32.totalorder %v965_v47, 1 }
 0x25a   : > { %339 = vrot.lane.b32.xlu1 %v808_v34, %s822_s22  ;;  %v338_v41 = vmul.f32 %v685_v36, %v337_v37 }
 0x2c4   : > { %v301_v30 = vpop.permute.xlu1 %300 }
 0x2c5   : > { %v303_v32 = vmul.f32 %v301_v30, %v298_v28 }
 0x2c7   : > { %v308_v33 = vadd.f32 %v307_v31, %v303_v32 }
 0x2c9   : > { %354 = vst [vmem:[#allocation1] ss:$4 sm:$0xff] %v308_v33 }
 0x2cc   : > { %v340_v39 = vpop.permute.xlu1 %339 }
 0x2cd   : > { %v342_v40 = vmul.f32 %v340_v39, %v321_v35 }
 0x2cf   : > { %v343_v42 = vadd.f32 %v342_v40, %v338_v41 }
 0x2d0   : > { %v961_v43 = vld.sshfl [vmem:[#allocation1] sm:$0xff pattern:$0x73625140] }
 0x2d1   : > { %376 = vst [vmem:[#allocation1] ss:$4 sm:$0xff] %v308_v33  ;;  %v368_v44 = vsel %vm367_vm7, %v343_v42, 0.0  ;;  %v382_v45 = vsel %vm367_vm7, %v343_v42, %v340_v39 }
 0x2d2   : > { %384 = vrot.lane.b32.xlu2 %v382_v45, %s821_s5 }
 0x2d8   : > { %v377_v46 = vld.sshfl [vmem:[#allocation1] sm:$0xff pattern:$0x73625140] }
 0x2d9   : > { %378 = vrot.lane.b32.xlu1 %v377_v46, %s822_s22 }
 0x32c   : > { %v385_v49 = vpop.permute.xlu2 %384 }
 0x34b   : > { %v379_v48 = vpop.permute.xlu1 %378 }
 0x34c   : > { %v381_v50 = vsel %vm352_vm8, %v379_v48, %v808_v34 }
 0x34d   : > { %v972_v53 = vsel %vm87_vm0, %v381_v50, %v385_v49 }
 0x34e   : > { %625 = vmatmul.msk.f32.vlgmr.msra.gmra.mxu2 %vm238_vm4, %v972_v53  ;;  %626 = vmatmul.msk.f32.vlgmr.msra.gmra.mxu3 %vm238_vm4, %v972_v53 }
 0x3d1   : > { %v434_v56 = vpop.f32.mrf.mxu2  ;;  %v454_v34 = vpop.f32.mrf.mxu3 }
 0x3d2   : > { %v435_v57 = vadd.f32 %v434_v56, %v234_v51  ;;  %v455_v58 = vadd.f32 %v454_v34, %v235_v52  ;;  %v622_v51 = vld [vmem:[%s945_s25 + $0x4] sm:$0xf] }
 0x3d4   : > { %498 = vrot.lane.b32.xlu0 %v455_v58, %s823_s23  ;;  %463 = vrot.lane.b32.xlu1 %v435_v57, %s823_s23  ;;  %v484_v59 = vadd.f32 %v435_v57, %v397_v54  ;;  %v492_v60 = vadd.f32 %v490_v55, %v455_v58  ;;  %v457_v63 = vadd.f32 %v622_v51, %v435_v57 }
 0x3d6   : > { %v458_v52 = vmul.f32 0.5, %v457_v63  ;;  %v485_v9 = vmul.f32 0.5, %v484_v59  ;;  %v493_v14 = vmul.f32 0.5, %v492_v60 }
 0x3d8   : > { %686 = vtanh.f32 %v458_v52 }
 0x3d9   : > { %688 = vtanh.f32 %v485_v9 }
 0x3dc   : > { %502 = vrot.lane.b32.xlu0 %v397_v54, %s822_s22 }
 0x3de   : > { %v687_v2 = vpop.eup %686 }
 0x3df   : > { %v460_v3 = vadd.f32 1.0, %v687_v2  ;;  %v689_v12 = vpop.eup %688 }
 0x3e0   : > { %v487_v15 = vadd.f32 1.0, %v689_v12 }
 0x3e1   : > { %v461_v4 = vmul.f32 0.5, %v460_v3 }
 0x3e2   : > { %v488_v17 = vmul.f32 0.5, %v487_v15 }
 0x3e3   : > { %v473_v21 = vsub.f32 1.0, %v461_v4 }
 0x3e4   : > { %539 = vperm.xlu0 %675, %v537_v62  }
 0x3ec   : > { %370 = vrot.lane.b32.xlu0 %v368_v44, %s821_s5 }
 0x446   : > { %v464_v5 = vpop.permute.xlu1 %463  ;;  %v499_v16 = vpop.permute.xlu0 %498 }
 0x447   : > { %v466_v6 = vmul.f32 %v464_v5, %v461_v4  ;;  %v501_v18 = vmul.f32 %v499_v16, %v488_v17 }
 0x449   : > { %468 = vrot.lane.b32.xlu2 %v466_v6, %s823_s23 }
 0x44e   : > { %v503_v19 = vpop.permute.xlu0 %502 }
 0x44f   : > { %v504_v27 = vrot.slane %v503_v19, 2 }
 0x451   : > { %479 = vrot.lane.b32.xlu2 %v972_v53, %s821_s5 }
 0x456   : > { %v540_v28 = vpop.permute.xlu0 %539 }
 0x457   : > { %vm541_vm13 = vcmp.eq.s32.totalorder %v540_v28, 1 }
 0x459   : > { %514 = vrot.lane.b32.xlu2 %v972_v53, %s822_s22 }
 0x45e   : > { %v371_v40 = vpop.permute.xlu0 %370 }
 0x461   : > { %525 = vperm.xlu2 %674, %v523_v8  }
 0x4a3   : > { %v469_v10 = vpop.permute.xlu2 %468 }
 0x4a4   : > { %v471_v11 = vadd.f32 %v622_v51, %v469_v10 }
 0x4a6   : > { %690 = vtanh.f32 %v471_v11 }
 0x4a7   : > { %692 = vtanh.f32 %v493_v14 }
 0x4ab   : > { %v480_v20 = vpop.permute.xlu2 %479 }
 0x4ac   : > { %v691_v13 = vpop.eup %690  ;;  %v482_v23 = vmul.f32 %v480_v20, %v461_v4 }
 0x4ad   : > { %475 = vrot.lane.b32.xlu1 %v691_v13, %s822_s22  ;;  %v693_v26 = vpop.eup %692 }
 0x4ae   : > { %v495_v29 = vadd.f32 1.0, %v693_v26 }
 0x4b0   : > { %v496_v32 = vmul.f32 0.5, %v495_v29 }
 0x4b2   : > { %v512_v36 = vsub.f32 1.0, %v496_v32 }
 0x4b3   : > { %v515_v35 = vpop.permute.xlu2 %514 }
 0x4b4   : > { %v517_v41 = vmul.f32 %v515_v35, %v496_v32 }
 0x4b5   : > { %507 = vrot.lane.b32.xlu1 %v501_v18, %s821_s5 }
 0x4bb   : > { %v526_v47 = vpop.permute.xlu2 %525 }
 0x4bc   : > { %vm527_vm14 = vcmp.eq.s32.totalorder %v526_v47, 1 }
 0x4bd   : > { %356 = vrot.lane.b32.xlu1 %v961_v43, %s822_s22 }
 0x51f   : > { %v476_v22 = vpop.permute.xlu1 %475 }
 0x520   : > { %v478_v24 = vmul.f32 %v476_v22, %v473_v21 }
 0x522   : > { %v483_v25 = vadd.f32 %v482_v23, %v478_v24 }
 0x524   : > { %529 = vst [vmem:[#allocation1] ss:$4 sm:$0xff] %v483_v25 }
 0x527   : > { %v508_v30 = vpop.permute.xlu1 %507 }
 0x528   : > { %v510_v31 = vadd.f32 %v508_v30, %v504_v27 }
 0x52a   : > { %694 = vtanh.f32 %v510_v31 }
 0x52b   : > { %v530_v33 = vld.sshfl [vmem:[#allocation1] sm:$0xff pattern:$0x73625140] }
 0x52c   : > { %531 = vrot.lane.b32.xlu1 %v530_v33, %s822_s22  ;;  %549 = vst [vmem:[#allocation1] ss:$4 sm:$0xff] %v483_v25 }
 0x52f   : > { %v357_v37 = vpop.permute.xlu1 %356 }
 0x530   : > { %v695_v38 = vpop.eup %694  ;;  %v359_v39 = vsel %vm352_vm8, %v357_v37, 0.0 }
 0x531   : > { %v513_v42 = vmul.f32 %v695_v38, %v512_v36  ;;  %362 = vst.msk [vmem:[%s360_s8] sm:$0x3] %vm361_vm11, %v359_v39 }
 0x532   : > { %375 = vst.msk [vmem:[%s373_s9] sm:$0x3] %vm374_vm12, %v371_v40 }
 0x533   : > { %v550_v43 = vld.sshfl [vmem:[#allocation1] sm:$0xff pattern:$0x73625140]  ;;  %v518_v44 = vadd.f32 %v517_v41, %v513_v42 }
 0x534   : > { %551 = vrot.lane.b32.xlu2 %v550_v43, %s822_s22 }
 0x535   : > { %v555_v45 = vsel %vm541_vm13, %v518_v44, %v515_v35  ;;  %v542_v46 = vsel %vm541_vm13, %v518_v44, 0.0 }
 0x536   : > { %557 = vrot.lane.b32.xlu1 %v555_v45, %s821_s5  ;;  %544 = vrot.lane.b32.xlu0 %v542_v46, %s821_s5 }
 0x58e   : > { %v552_v50 = vpop.permute.xlu2 %551 }
 0x58f   : > { %v554_v55 = vsel %vm527_vm14, %v552_v50, %v972_v53 }
 0x59e   : > { %v532_v48 = vpop.permute.xlu1 %531 }
 0x59f   : > { %v534_v49 = vsel %vm527_vm14, %v532_v48, 0.0 }
 0x5a0   : > { %629 = vst.msk [vmem:[%s360_s8 + $0x2] sm:$0x3] %vm361_vm11, %v534_v49 }
 0x5a5   :  { %204 = sbr.rel (!%p202_p0) target bundleno = 209 (0xd1), region = 84 }
 0x5a8   : > { %v558_v54 = vpop.permute.xlu1 %557  ;;  %v545_v56 = vpop.permute.xlu0 %544 }
 0x5a9   : > { %v560_v34 = vsel %vm87_vm0, %v554_v55, %v558_v54   ;;  %548 = vst.msk [vmem:[%s547_s1] sm:$0x3] %vm374_vm12, %v545_v56 }
 0x5aa   :  { %573 = dma.vmem_to_hbm [thread:$0]  %s566_s0, 256, %s568_s13, [#allocation5], %s826_s15, %s826_s15, %s827_s16  }
 0x5ab   :  { %804 = dma.done.wait [#allocation5], 256  }
 0x5ac   :  { %805 = vsyncadd [#allocation5], 4294967040 }
 0x5ad   :  { %578 = vsyncpa [#allocation4], 1 }
 0x5ae   :  { %579 = vsyncpa [#allocation7], 1 }
 0x5af   :  { %580 = vsyncpa [#allocation5], 1 }

</bundles_post_ra>
